<compile_context>
chip_gen: v7x
topology: tpu7x:2x2x1
jax: 0.10.0
libtpu: 0.0.40
codegen_flags: <defaults>
</compile_context>

<pallas_src>
import functools
import types

import jax
import jax.numpy as jnp
from jax.experimental import pallas as pl
from jax.experimental.pallas import tpu as pltpu


_VMEM_LIMIT = 32 * 1024 * 1024         # scoped-VMEM cap for large-tile calls (safe v5e..v7x)
_BLOCK_BYTE_BUDGET = 2 * 1024 * 1024   # ~2 MiB image block -> ~85% of HBM copy roofline


# ----------------------------------------------------------------------------
# RangeMix — fast path: output aliased onto sample A, copy only odd strips of B
# ----------------------------------------------------------------------------
def _range_strip_copy_kernel(img_a_ref, lab_a_ref, img_b_ref, lab_b_ref,
                             img_o_ref, lab_o_ref):
    # img_a_ref / lab_a_ref are untouched HBM refs (aliased onto the outputs):
    # even strips keep sample A's data with zero extra traffic.
    del img_a_ref, lab_a_ref
    img_o_ref[...] = img_b_ref[...]
    lab_o_ref[...] = lab_b_ref[...]


def _pick_strip_tile(strip_w, lane_col_bytes):
    """Largest 128-multiple divisor of strip_w whose image block fits the byte budget.

    Prefer the whole strip per grid step (review: size by bytes, not a 512-lane
    cap); sub-tile only when the image block would exceed ~2 MiB.
    """
    if strip_w * lane_col_bytes <= _BLOCK_BYTE_BUDGET:
        return strip_w
    for k in range(strip_w // 128, 0, -1):
        tw = 128 * k
        if strip_w % tw == 0 and tw * lane_col_bytes <= _BLOCK_BYTE_BUDGET:
            return tw
    return 128


def _range_mix_strip_copy(img_a, lab_a, img_b, lab_b, factor, strip_w):
    B, C, H, W = img_a.shape
    itemsize = jnp.dtype(img_a.dtype).itemsize
    lab_itemsize = jnp.dtype(lab_a.dtype).itemsize

    tw = _pick_strip_tile(strip_w, C * H * itemsize)
    bps = strip_w // tw                                    # blocks per strip
    # TODO(synk): for very narrow strips (<512 lanes) the HBM rows of one block
    # are short (<2 KiB) which is descriptor-bound on v7x; a manual-DMA variant
    # issuing several odd-strip copies per step would recover more bandwidth.

    img_map = lambda b, j, k: (b, 0, 0, (2 * j + 1) * bps + k)
    lab_map = lambda b, j, k: (b, 0, (2 * j + 1) * bps + k)

    odd_w = factor * strip_w                               # total odd-strip width (= W // 2)
    bytes_accessed = 2 * B * odd_w * (C * H * itemsize + H * lab_itemsize)

    return pl.pallas_call(
        _range_strip_copy_kernel,
        grid=(B, factor, bps),
        in_specs=[
            pl.BlockSpec(memory_space=pl.ANY),             # img_a (aliased -> out 0)
            pl.BlockSpec(memory_space=pl.ANY),             # lab_a (aliased -> out 1)
            pl.BlockSpec((1, C, H, tw), img_map),          # img_b, odd strips only
            pl.BlockSpec((1, H, tw), lab_map),             # lab_b, odd strips only
        ],
        out_specs=[
            pl.BlockSpec((1, C, H, tw), img_map),
            pl.BlockSpec((1, H, tw), lab_map),
        ],
        out_shape=[
            jax.ShapeDtypeStruct((B, C, H, W), img_a.dtype),
            jax.ShapeDtypeStruct((B, H, W), lab_a.dtype),
        ],
        input_output_aliases={0: 0, 1: 1},
        compiler_params=pltpu.CompilerParams(
            dimension_semantics=("parallel", "parallel", "parallel"),
            vmem_limit_bytes=_VMEM_LIMIT),
        cost_estimate=pl.CostEstimate(flops=0, transcendentals=0,
                                      bytes_accessed=int(bytes_accessed)),
    )(img_a, lab_a, img_b, lab_b)


# ----------------------------------------------------------------------------
# RangeMix — generic path: lane-tiled masked select (strip mask computed in-kernel)
# ----------------------------------------------------------------------------
def _range_select_kernel(img_a_ref, lab_a_ref, img_b_ref, lab_b_ref,
                         img_o_ref, lab_o_ref, *, n_strips, full_w, tile_w):
    w0 = pl.program_id(1) * tile_w
    w_idx = w0 + jax.lax.broadcasted_iota(jnp.int32, (1, tile_w), 1)   # (1, tw)
    if full_w % n_strips == 0:
        # div by a compile-time constant (a shift when the strip width is pow2)
        strip = w_idx // (full_w // n_strips)
    else:
        strip = (w_idx * n_strips) // full_w
    take_a = (strip & 1) == 0                                          # (1, tw)
    img_mask = jnp.broadcast_to(take_a[:, None, None, :], img_a_ref.shape)
    lab_mask = jnp.broadcast_to(take_a[:, None, :], lab_a_ref.shape)
    img_o_ref[...] = jnp.where(img_mask, img_a_ref[...], img_b_ref[...])
    lab_o_ref[...] = jnp.where(lab_mask, lab_a_ref[...], lab_b_ref[...])


def _pick_lane_tile(W, lane_col_bytes):
    """Byte-budgeted lane tile (multiple of 128, or the full width)."""
    if W % 128 != 0 or W * lane_col_bytes <= _BLOCK_BYTE_BUDGET:
        return W
    tw = max(128, (_BLOCK_BYTE_BUDGET // lane_col_bytes) // 128 * 128)
    tw = min(tw, W)
    while W % tw != 0 and tw > 128:        # prefer a tile that divides W (no padded tail)
        tw -= 128
    return tw


def _range_mix_select(img_a, lab_a, img_b, lab_b, n_strips):
    B, C, H, W = img_a.shape
    itemsize = jnp.dtype(img_a.dtype).itemsize
    lab_itemsize = jnp.dtype(lab_a.dtype).itemsize
    tw = _pick_lane_tile(W, C * H * itemsize)

    kernel = functools.partial(_range_select_kernel, n_strips=n_strips,
                               full_w=W, tile_w=tw)
    img_spec = pl.BlockSpec((1, C, H, tw), lambda b, w: (b, 0, 0, w))
    lab_spec = pl.BlockSpec((1, H, tw), lambda b, w: (b, 0, w))
    bytes_accessed = 3 * B * W * (C * H * itemsize + H * lab_itemsize)

    return pl.pallas_call(
        kernel,
        grid=(B, pl.cdiv(W, tw)),
        in_specs=[img_spec, lab_spec, img_spec, lab_spec],
        out_specs=[img_spec, lab_spec],
        out_shape=[
            jax.ShapeDtypeStruct((B, C, H, W), img_a.dtype),
            jax.ShapeDtypeStruct((B, H, W), lab_a.dtype),
        ],
        compiler_params=pltpu.CompilerParams(
            dimension_semantics=("parallel", "parallel"),
            vmem_limit_bytes=_VMEM_LIMIT),
        cost_estimate=pl.CostEstimate(flops=0, transcendentals=0,
                                      bytes_accessed=int(bytes_accessed)),
    )(img_a, lab_a, img_b, lab_b)


def _range_mix(img_a, lab_a, img_b, lab_b, *, range_mix_factor=4):
    _, _, _, W = img_a.shape
    n_strips = 2 * range_mix_factor
    if W % n_strips == 0 and (W // n_strips) % 128 == 0:
        return _range_mix_strip_copy(img_a, lab_a, img_b, lab_b,
                                     range_mix_factor, W // n_strips)
    # TODO(synk): non-128-aligned strips could also use the 1x-traffic alias +
    # manual pltpu.make_async_copy of exact odd-strip element slices; kept as
    # the masked-select fallback (3x traffic) for robustness.
    return _range_mix_select(img_a, lab_a, img_b, lab_b, n_strips)


range_mix = jax.jit(_range_mix, static_argnames=("range_mix_factor",))
# Production entry point: donating A makes the aliased fast path a true ~1x-HBM
# copy (without donation XLA inserts a hidden full copy of A -> ~2x traffic).
range_mix_donated = jax.jit(_range_mix, static_argnames=("range_mix_factor",),
                            donate_argnums=(0, 1))


# ----------------------------------------------------------------------------
# VoxelMix — keep A inside radius, take B outside; swapped-in B points that
# actually lie inside the keep radius get ignore_index on the labels.
# ----------------------------------------------------------------------------
def _voxel_mix_kernel(feat_a_ref, feat_b_ref, lab_a_ref, lab_b_ref,
                      feat_o_ref, lab_o_ref, *, r2, ignore_index):
    fa = feat_a_ref[...]                                   # (1, F, ts, 128)
    fb = feat_b_ref[...]
    ra2 = fa[:, 0] * fa[:, 0] + fa[:, 1] * fa[:, 1]        # (1, ts, 128)
    rb2 = fb[:, 0] * fb[:, 0] + fb[:, 1] * fb[:, 1]
    keep_a = ra2 <= r2                                     # sqrt-free radius test
    feat_o_ref[...] = jnp.where(keep_a[:, None], fa, fb)
    la = lab_a_ref[...]                                    # (1, ts, 128)
    lb = lab_b_ref[...]
    swapped = jnp.where(rb2 > r2, lb, jnp.full_like(lb, ignore_index))
    lab_o_ref[...] = jnp.where(keep_a, la, swapped)


@functools.partial(jax.jit, static_argnames=("radius_keep", "ignore_index"))
def voxel_mix(feat_a, lab_a, feat_b, lab_b, *, radius_keep=20.0,
              ignore_index=255):
    B, F, N = feat_a.shape
    # TODO(synk): pad/handle N % 128 != 0 point clouds; KITTI pipelines pad anyway.
    assert N % 128 == 0, "voxel_mix expects the point count N % 128 == 0"
    ns = N // 128
    ts = ns if ns <= 512 else 512        # ~1 MiB feature block (F=4): amortizes per-step cost

    # Lane-dense layout: trailing dims (ns, 128) — no sublane padding for F=4
    # feature rows or the single label row.  Reshapes are row-major bitcasts.
    fa = feat_a.reshape(B, F, ns, 128)
    fb = feat_b.reshape(B, F, ns, 128)
    la = lab_a.reshape(B, ns, 128)
    lb = lab_b.reshape(B, ns, 128)

    itemsize = jnp.dtype(feat_a.dtype).itemsize
    lab_itemsize = jnp.dtype(lab_a.dtype).itemsize
    bytes_accessed = 3 * B * N * (F * itemsize + lab_itemsize)
    # TODO(synk): carrying labels as int8 (values 0..19, 255) would trim ~15% of
    # total HBM traffic; kept int32 to preserve the module's dtype contract.

    kernel = functools.partial(_voxel_mix_kernel,
                               r2=float(radius_keep) ** 2,
                               ignore_index=ignore_index)
    feat_spec = pl.BlockSpec((1, F, ts, 128), lambda b, n: (b, 0, n, 0))
    lab_spec = pl.BlockSpec((1, ts, 128), lambda b, n: (b, n, 0))
    feat_o, lab_o = pl.pallas_call(
        kernel,
        grid=(B, pl.cdiv(ns, ts)),
        in_specs=[feat_spec, feat_spec, lab_spec, lab_spec],
        out_specs=[feat_spec, lab_spec],
        out_shape=[
            jax.ShapeDtypeStruct((B, F, ns, 128), feat_a.dtype),
            jax.ShapeDtypeStruct((B, ns, 128), lab_a.dtype),
        ],
        compiler_params=pltpu.CompilerParams(
            dimension_semantics=("parallel", "parallel"),
            vmem_limit_bytes=_VMEM_LIMIT),
        cost_estimate=pl.CostEstimate(flops=0, transcendentals=0,
                                      bytes_accessed=int(bytes_accessed)),
    )(fa, fb, la, lb)
    return feat_o.reshape(B, F, N), lab_o.reshape(B, 1, N)


# ----------------------------------------------------------------------------
# CutMix dispatcher (mirrors the PyTorch module's forward).
# ----------------------------------------------------------------------------
class CutMix:
    def __init__(self, param):
        self.param = param
        self.range_mix_factor = 4            # RangeMix(range_mix_factor=4)
        self.radius_keep = 20.0              # VoxelMix(radius_keep=20, ...)
        self.ignore_index = param.ignore_index
        # TODO(synk): param.batch_size / param.grid_size are carried by the
        # original VoxelMix but unused by this simplified mix rule.

    def __call__(self, *mix_info, modality):
        assert modality in ['range', 'voxel'], 'modality error.'
        if modality == 'range':
            return range_mix(*mix_info, range_mix_factor=self.range_mix_factor)
        return voxel_mix(*mix_info, radius_keep=self.radius_keep,
                         ignore_index=self.ignore_index)


if __name__ == "__main__":
    key = jax.random.PRNGKey(0)
    k = jax.random.split(key, 8)

    param = types.SimpleNamespace(batch_size=2, grid_size=(480, 360, 32),
                                  ignore_index=255)
    cutmix = CutMix(param)

    # ---- range view (fast strip-copy path: strip width 1024/8 = 128 lanes) ----
    B, C, H, W = 2, 5, 16, 1024
    img_a = jax.random.normal(k[0], (B, C, H, W), dtype=jnp.float32)
    img_b = jax.random.normal(k[1], (B, C, H, W), dtype=jnp.float32)
    lab_a = jax.random.randint(k[2], (B, H, W), 0, 19, dtype=jnp.int32)
    lab_b = jax.random.randint(k[3], (B, H, W), 0, 19, dtype=jnp.int32)
    r_img, r_lab = cutmix(img_a, lab_a, img_b, lab_b, modality='range')

    # same fast path, but with donated A (true ~1x-traffic production mode)
    img_a_d, lab_a_d = jnp.copy(img_a), jnp.copy(lab_a)
    d_img, d_lab = range_mix_donated(img_a_d, lab_a_d, img_b, lab_b,
                                     range_mix_factor=4)

    # ---- range view (generic lane-tiled select path: strip width 32 lanes) ----
    W2 = 256
    img_a2, img_b2 = img_a[..., :W2], img_b[..., :W2]
    lab_a2, lab_b2 = lab_a[..., :W2], lab_b[..., :W2]
    r_img2, r_lab2 = cutmix(img_a2, lab_a2, img_b2, lab_b2, modality='range')

    # ---- voxel view ----
    F, N = 4, 1024
    feat_a = 40.0 * jax.random.normal(k[4], (B, F, N), dtype=jnp.float32)
    feat_b = 40.0 * jax.random.normal(k[5], (B, F, N), dtype=jnp.float32)
    vlab_a = jax.random.randint(k[6], (B, 1, N), 0, 19, dtype=jnp.int32)
    vlab_b = jax.random.randint(k[7], (B, 1, N), 0, 19, dtype=jnp.int32)
    v_feat, v_lab = cutmix(feat_a, vlab_a, feat_b, vlab_b, modality='voxel')

    jax.block_until_ready((r_img, r_lab, d_img, d_lab,
                           r_img2, r_lab2, v_feat, v_lab))

    # ---- sanity checks ----
    sw = W // 8
    take_a_w = ((jnp.arange(W) // sw) % 2) == 0            # (W,) even strips -> A
    exp_img = jnp.where(take_a_w, img_a, img_b)
    exp_lab = jnp.where(take_a_w, lab_a, lab_b)
    assert bool(jnp.all(r_img == exp_img))
    assert bool(jnp.all(r_lab == exp_lab))
    assert bool(jnp.all(d_img == exp_img))
    assert bool(jnp.all(d_lab == exp_lab))

    sw2 = W2 // 8
    take_a_w2 = ((jnp.arange(W2) // sw2) % 2) == 0
    assert bool(jnp.all(r_img2 == jnp.where(take_a_w2, img_a2, img_b2)))
    assert bool(jnp.all(r_lab2 == jnp.where(take_a_w2, lab_a2, lab_b2)))

    r2 = 20.0 ** 2
    keep = (feat_a[:, 0] ** 2 + feat_a[:, 1] ** 2 <= r2)[:, None]      # (B,1,N)
    b_in = (feat_b[:, 0] ** 2 + feat_b[:, 1] ** 2 <= r2)[:, None]
    exp_feat = jnp.where(keep, feat_a, feat_b)
    exp_vlab = jnp.where(keep, vlab_a, jnp.where(b_in, 255, vlab_b))
    assert bool(jnp.all(v_feat == exp_feat))
    assert bool(jnp.all(v_lab == exp_vlab))

    print("KERNEL_OK")
</pallas_src>

<mosaic_0001>
module attributes {stable_mosaic.version = 11 : i64} {
  func.func @_range_strip_copy_kernel(%arg0: i32, %arg1: i32, %arg2: i32, %arg3: memref<2x5x16x1024xf32, #tpu.memory_space<any>>, %arg4: memref<2x16x1024xi32, #tpu.memory_space<any>>, %arg5: memref<1x5x16x128xf32, #tpu.memory_space<vmem>>, %arg6: memref<1x16x128xi32, #tpu.memory_space<vmem>>, %arg7: memref<1x5x16x128xf32, #tpu.memory_space<vmem>>, %arg8: memref<1x16x128xi32, #tpu.memory_space<vmem>>) attributes {dimension_semantics = [#tpu.dimension_semantics<parallel>, #tpu.dimension_semantics<parallel>, #tpu.dimension_semantics<parallel>], iteration_bounds = array<i64: 2, 4, 1>, scalar_prefetch = 0 : i64, scratch_operands = 0 : i64, tpu.core_type = #tpu.core_type<tc>, window_params = [{}, {}, {transform_indices = @transform_2, window_bounds = array<i64: 1, 5, 16, 128>}, {transform_indices = @transform_3, window_bounds = array<i64: 1, 16, 128>}, {transform_indices = @transform_4, window_bounds = array<i64: 1, 5, 16, 128>}, {transform_indices = @transform_5, window_bounds = array<i64: 1, 16, 128>}]} {
    %c0 = arith.constant 0 : index
    %c0_0 = arith.constant 0 : index
    %c0_1 = arith.constant 0 : index
    %c0_2 = arith.constant 0 : index
    %0 = vector.load %arg5[%c0, %c0_0, %c0_1, %c0_2] : memref<1x5x16x128xf32, #tpu.memory_space<vmem>>, vector<1x5x16x128xf32>
    %c0_3 = arith.constant 0 : index
    %c0_4 = arith.constant 0 : index
    %c0_5 = arith.constant 0 : index
    %c0_6 = arith.constant 0 : index
    %1 = vector.load %arg7[%c0_3, %c0_4, %c0_5, %c0_6] : memref<1x5x16x128xf32, #tpu.memory_space<vmem>>, vector<1x5x16x128xf32>
    tpu.vector_store %arg7[%c0_3, %c0_4, %c0_5, %c0_6], %0 {strides = array<i32>} : memref<1x5x16x128xf32, #tpu.memory_space<vmem>>, vector<1x5x16x128xf32>,
    %c0_7 = arith.constant 0 : index
    %c0_8 = arith.constant 0 : index
    %c0_9 = arith.constant 0 : index
    %2 = vector.load %arg6[%c0_7, %c0_8, %c0_9] : memref<1x16x128xi32, #tpu.memory_space<vmem>>, vector<1x16x128xi32>
    %c0_10 = arith.constant 0 : index
    %c0_11 = arith.constant 0 : index
    %c0_12 = arith.constant 0 : index
    %3 = vector.load %arg8[%c0_10, %c0_11, %c0_12] : memref<1x16x128xi32, #tpu.memory_space<vmem>>, vector<1x16x128xi32>
    tpu.vector_store %arg8[%c0_10, %c0_11, %c0_12], %2 {strides = array<i32>} : memref<1x16x128xi32, #tpu.memory_space<vmem>>, vector<1x16x128xi32>,
    return
  }
  func.func @transform_2(%arg0: i32, %arg1: i32, %arg2: i32) -> (i32, i32, i32, i32) {
    %c2_i32 = arith.constant 2 : i32
    %0 = arith.muli %c2_i32, %arg1 : i32
    %c1_i32 = arith.constant 1 : i32
    %1 = arith.addi %0, %c1_i32 : i32
    %c1_i32_0 = arith.constant 1 : i32
    %2 = arith.muli %1, %c1_i32_0 : i32
    %3 = arith.addi %2, %arg2 : i32
    %c0_i32 = arith.constant 0 : i32
    %c0_i32_1 = arith.constant 0 : i32
    %c0_i32_2 = arith.constant 0 : i32
    return %arg0, %c0_i32, %c0_i32_1, %3 : i32, i32, i32, i32
  }
  func.func @transform_3(%arg0: i32, %arg1: i32, %arg2: i32) -> (i32, i32, i32) {
    %c2_i32 = arith.constant 2 : i32
    %0 = arith.muli %c2_i32, %arg1 : i32
    %c1_i32 = arith.constant 1 : i32
    %1 = arith.addi %0, %c1_i32 : i32
    %c1_i32_0 = arith.constant 1 : i32
    %2 = arith.muli %1, %c1_i32_0 : i32
    %3 = arith.addi %2, %arg2 : i32
    %c0_i32 = arith.constant 0 : i32
    %c0_i32_1 = arith.constant 0 : i32
    return %arg0, %c0_i32, %3 : i32, i32, i32
  }
  func.func @transform_4(%arg0: i32, %arg1: i32, %arg2: i32) -> (i32, i32, i32, i32) {
    %c2_i32 = arith.constant 2 : i32
    %0 = arith.muli %c2_i32, %arg1 : i32
    %c1_i32 = arith.constant 1 : i32
    %1 = arith.addi %0, %c1_i32 : i32
    %c1_i32_0 = arith.constant 1 : i32
    %2 = arith.muli %1, %c1_i32_0 : i32
    %3 = arith.addi %2, %arg2 : i32
    %c0_i32 = arith.constant 0 : i32
    %c0_i32_1 = arith.constant 0 : i32
    %c0_i32_2 = arith.constant 0 : i32
    return %arg0, %c0_i32, %c0_i32_1, %3 : i32, i32, i32, i32
  }
  func.func @transform_5(%arg0: i32, %arg1: i32, %arg2: i32) -> (i32, i32, i32) {
    %c2_i32 = arith.constant 2 : i32
    %0 = arith.muli %c2_i32, %arg1 : i32
    %c1_i32 = arith.constant 1 : i32
    %1 = arith.addi %0, %c1_i32 : i32
    %c1_i32_0 = arith.constant 1 : i32
    %2 = arith.muli %1, %c1_i32_0 : i32
    %3 = arith.addi %2, %arg2 : i32
    %c0_i32 = arith.constant 0 : i32
    %c0_i32_1 = arith.constant 0 : i32
    return %arg0, %c0_i32, %3 : i32, i32, i32
  }
}

</mosaic_0001>

<bundles_post_ra>
// kernel: _range_mix.1
= control target key start
LH: loop header
LB: loop body
LE: loop exit
PB: predicated region body
PF: predicated region fallthrough
CT: control target
= control target key end

     0   :  { %s1102_s0 = inlined_call_operand.hbm [shape: f32[2,5,16,1024], index: 0, kind: input, shape index: {}, may-alias: {0,4}]   ;;  %s1103_s1 = inlined_call_operand.hbm [shape: s32[2,16,1024], index: 1, kind: input, shape index: {}, may-alias: {1,5}]   ;;  %s1104_s2 = inlined_call_operand.vmem [shape: f32[2,5,16,1024], index: 2, kind: input, shape index: {}]   ;;  %s1105_s3 = inlined_call_operand.vmem [shape: s32[2,16,1024], index: 3, kind: input, shape index: {}]   ;;  %s1106_s4 = inlined_call_operand.hbm [shape: f32[2,5,16,1024], index: 4, kind: output, shape index: {0}, may-alias: {0,4}]   ;;  %s1107_s5 = inlined_call_operand.hbm [shape: s32[2,16,1024], index: 5, kind: output, shape index: {1}, may-alias: {1,5}]  }
   0x1   :  { %1111 = sst [smem:[#allocation12_spill]] %s1104_s2 }
   0x2   :  { %1112 = sst [smem:[#allocation13_spill]] %s1105_s3 }
   0x3   :  { %1113 = sst [smem:[#allocation14_spill]] %s1106_s4 }
   0x4   :  { %11 = vsyncpa [#allocation5], 0 }
   0x5   :  { %13 = vsyncpa [#allocation5 + $0x1], 0 }
   0x6   :  { %14 = vsyncpa [#allocation7], 0 }
   0x7   :  { %16 = vsyncpa [#allocation7 + $0x1], 0  ;;  %s889_s0 = smov 0   ;;  %s891_s18 = smov 0  }
   0x8   :  { %s893_s1 = smov 0   ;;  %s895_s19 = smov 0  }
   0x9   :  { %s897_s20 = smov 0   ;;  %s899_s21 = smov 0  }
   0xa   :  { %s901_s22 = smov 0   ;;  %s903_s23 = smov 0  }
   0xb LB: > { %s602_s24 = sadd.s32 4294967295, %s852_s23   ;;  %s603_s25 = sadd.s32 4294967294, %s852_s23   ;;  %s852_s23 = sphi %s903_s23, %s22_s23   ;;  %s848_s22 = sphi %s901_s22, %s1133_s22   ;;  %s844_s21 = sphi %s899_s21, %s1132_s21   ;;  %s840_s20 = sphi %s897_s20, %s1131_s20   ;;  %s836_s19 = sphi %s895_s19, %s1130_s19   ;;  %s832_s1 = sphi %s893_s1, %s1129_s1   ;;  %s828_s18 = sphi %s891_s18, %s1128_s18   ;;  %s824_s0 = sphi %s889_s0, %s1127_s0  }
   0xc   : > { %s37_s26 = sadd.s32 1, %s844_s21  ;;  %s41_s27 = sadd.s32 1, %s848_s22 }
   0xd   : > { %p39_p0 = scmp.ge.s32.totalorder %s37_s26, 4  ;;  %s934_s28 = sshll.u32 %s844_s21, 1 }
   0xe   : > { %s46_s29 = sadd.s32 1, %s934_s28  ;;  %s56_s30 = sadd.s32 1, %s832_s1 }
   0xf   : > { %s1135_s26 = smov (%p39_p0, %s37_s26), 0  ;;  %s1137_s27 = smov (!%p39_p0, %s41_s27), %s848_s22 }
  0x10   : > { %1114 = sst [smem:[#allocation10_spill]] %s1135_s26  ;;  %s605_s6 = sshll.u32 %s1135_s26, 1 }
  0x11   : > { %p63_p1 = scmp.ne.s32.totalorder %s832_s1, %s828_s18  ;;  %p43_p2 = scmp.ge.s32.totalorder %s1137_s27, 2 }
  0x12   : > { %s49_s7 = sadd.s32 1, %s605_s6  ;;  %p64_p3 = scmp.eq.s32.totalorder %s852_s23, 0 }
  0x13   : > { %s52_s8 = ssub.s32 %s46_s29, %s49_s7  ;;  %s1139_s27 = smov (%p43_p2, %s1137_s27), 0 }
  0x14   : > { %1115 = sst [smem:[#allocation11_spill]] %s1139_s27  ;;  %p947_p4 = por %p64_p3, %p63_p1 }
  0x15   : > { %p135_p5 = scmp.eq.s32.totalorder %s602_s24, 7  ;;  %s51_s10 = ssub.s32 %s848_s22, %s1139_s27 }
  0x16   : > { %p140_p6 = scmp.ne.s32.totalorder %s828_s18, %s824_s0  ;;  %s53_s11 = sor.u32 %s52_s8, %s51_s10 }
  0x17   : > { %p955_p7 = por %p135_p5, %p63_p1  ;;  %p54_p8 = scmp.eq.s32.totalorder %s53_s11, 0 }
  0x18   : > { %p141_p9 = scmp.eq.s32.totalorder %s603_s25, 7  ;;  %p613_p11 = scmp.ge.s32.totalorder %s852_s23, 8 }
  0x19   : > { %s960_s13 = scalar_select %p54_p8, %s832_s1, %s56_s30  }
  0x1a   : > { %p962_p10 = por %p141_p9, %p140_p6  ;;  %191 = sbr.rel (%p613_p11) target bundleno = 64 (0x40), region = 16 }
  0x21   : > { %194 = sbr.rel (!%p947_p4) target bundleno = 52 (0x34), region = 20  ;;  %s196_s15 = sand.u32 (%p947_p4), 1, %s832_s1  }
  0x22   : > { %s490_s16 = smul.u32 (%p947_p4), 80, %s848_s22  ;;  %s1119_s2 = sld [smem:[#allocation12_spill]] (%p947_p4) }
  0x23   : > { %s643_s17 = smul.u32 (%p947_p4), 80, %s196_s15 }
  0x24   : > { %s491_s24 = sadd.s32 (%p947_p4), %s934_s28, %s490_s16 }
  0x25   : > { %s615_s25 = sshll.u32 (%p947_p4), %s491_s24, 3  ;;  %s198_s7 = scalar_lea.vmem (%p947_p4), [#allocation2], %s643_s17 }
  0x28   : > { %s493_s6 = scalar_lea.vmem %s1119_s2, %s615_s25 }
  0x29   : > { %v616_v0 = vld [vmem:[%s493_s6 + $0x8] sm:$0xff] }
  0x2a   : > { %v617_v1 = vld [vmem:[%s493_s6 + $0x48] sm:$0xff]  ;;  %252 = vst [vmem:[%s198_s7] sm:$0xff] %v616_v0 }
  0x2b   : > { %v618_v2 = vld [vmem:[%s493_s6 + $0x88] sm:$0xff]  ;;  %254 = vst [vmem:[%s198_s7 + $0x8] sm:$0xff] %v617_v1 }
  0x2c   : > { %256 = vst [vmem:[%s198_s7 + $0x10] sm:$0xff] %v618_v2  ;;  %v619_v3 = vld [vmem:[%s493_s6 + $0xc8] sm:$0xff] }
  0x2d   : > { %v620_v4 = vld [vmem:[%s493_s6 + $0x108] sm:$0xff]  ;;  %258 = vst [vmem:[%s198_s7 + $0x18] sm:$0xff] %v619_v3 }
  0x2e   : > { %v621_v5 = vld [vmem:[%s493_s6 + $0x148] sm:$0xff]  ;;  %260 = vst [vmem:[%s198_s7 + $0x20] sm:$0xff] %v620_v4 }
  0x2f   : > { %262 = vst [vmem:[%s198_s7 + $0x28] sm:$0xff] %v621_v5  ;;  %v622_v6 = vld [vmem:[%s493_s6 + $0x188] sm:$0xff] }
  0x30   : > { %v623_v7 = vld [vmem:[%s493_s6 + $0x1c8] sm:$0xff]  ;;  %264 = vst [vmem:[%s198_s7 + $0x30] sm:$0xff] %v622_v6 }
  0x31   : > { %v624_v8 = vld [vmem:[%s493_s6 + $0x208] sm:$0xff]  ;;  %266 = vst [vmem:[%s198_s7 + $0x38] sm:$0xff] %v623_v7 }
  0x32   : > { %268 = vst [vmem:[%s198_s7 + $0x40] sm:$0xff] %v624_v8  ;;  %v625_v9 = vld [vmem:[%s493_s6 + $0x248] sm:$0xff] }
  0x33   : > { %270 = vst [vmem:[%s198_s7 + $0x48] sm:$0xff] %v625_v9 }
  0x34 PF: > { %276 = sbr.rel (!%p947_p4) target bundleno = 64 (0x40), region = 58  ;;  %s278_s8 = sand.u32 (%p947_p4), 1, %s832_s1  }
  0x35   : > { %s628_s10 = sshll.u32 (%p947_p4), %s848_s22, 4  ;;  %s626_s11 = sshll.u32 (%p947_p4), %s278_s8, 4 }
  0x36   : > { %s500_s15 = sadd.s32 (%p947_p4), %s628_s10, %s934_s28  ;;  %s1120_s3 = sld [smem:[#allocation13_spill]] (%p947_p4) }
  0x37   : > { %s629_s16 = sshll.u32 (%p947_p4), %s500_s15, 3  ;;  %s280_s29 = scalar_lea.vmem (%p947_p4), [#allocation3], %s626_s11 }
  0x3c   : > { %s502_s25 = scalar_lea.vmem %s1120_s3, %s629_s16 }
  0x3d   : > { %v630_v10 = vld [vmem:[%s502_s25 + $0x8] sm:$0xff] }
  0x3e   : > { %v631_v11 = vld [vmem:[%s502_s25 + $0x48] sm:$0xff]  ;;  %318 = vst [vmem:[%s280_s29] sm:$0xff] %v630_v10 }
  0x3f   : > { %320 = vst [vmem:[%s280_s29 + $0x8] sm:$0xff] %v631_v11 }
  0x40 PF: > { %p632_p12 = scmp.ge.s32.totalorder %s852_s23, 1  ;;  %p325_p13 = scmp.lt.s32.totalorder %s852_s23, 9 }
  0x42   : > { %p326_p0 = pnand %p632_p12, %p325_p13 }
  0x43   : > { %s986_s28 = sand.u32 (!%p326_p0), 1, %s828_s18   ;;  %s1108_s30 = sshll.u32 (!%p326_p0), %s836_s19, 1 }
  0x44   : > { %329 = sbr.rel (%p326_p0) target bundleno = 128 (0x80), region = 96  ;;  %s633_s6 = sshll.u32 (!%p326_p0), %s986_s28, 4 }
  0x45   : > { %s644_s9 = smul.u32 (!%p326_p0), 80, %s986_s28  ;;  %s341_s16 = scalar_lea.vmem (!%p326_p0), [#allocation3], %s633_s6 }
  0x46   : > { %s526_s7 = smul.u32 (!%p326_p0), 80, %s840_s20  ;;  %v403_v22 = vld [vmem:[%s341_s16] sm:$0xff] (!%p326_p0)  ;;  %v404_v23 = vld [vmem:[%s341_s16 + $0x8] sm:$0xff] (!%p326_p0)  ;;  %s1000_s24 = scalar_lea.vmem (!%p326_p0), [#allocation6], %s633_s6 }
  0x47   : > { %s334_s8 = scalar_lea.vmem (!%p326_p0), [#allocation2], %s644_s9  ;;  %s363_s10 = scalar_lea.vmem (!%p326_p0), [#allocation4], %s644_s9  ;;  %405 = vst [vmem:[%s1000_s24] sm:$0xff] (!%p326_p0), %v403_v22  ;;  %406 = vst [vmem:[%s1000_s24 + $0x8] sm:$0xff] (!%p326_p0), %v404_v23 }
  0x48   : > { %v383_v12 = vld [vmem:[%s334_s8] sm:$0xff] (!%p326_p0)  ;;  %s430_s11 = sshll.u32 (!%p326_p0), %s363_s10, 4  ;;  %v384_v13 = vld [vmem:[%s334_s8 + $0x8] sm:$0xff] (!%p326_p0)  ;;  %v385_v14 = vld [vmem:[%s334_s8 + $0x10] sm:$0xff] (!%p326_p0)  ;;  %s527_s15 = sadd.s32 (!%p326_p0), %s1108_s30, %s526_s7  ;;  %s994_s11 = int_to_ptr.vmem [resolvable:$true] %s430_s11 }
  0x49   : > { %393 = vst [vmem:[%s363_s10] sm:$0xff] (!%p326_p0), %v383_v12  ;;  %394 = vst [vmem:[%s363_s10 + $0x8] sm:$0xff] (!%p326_p0), %v384_v13  ;;  %v386_v15 = vld [vmem:[%s334_s8 + $0x18] sm:$0xff] (!%p326_p0)  ;;  %v387_v16 = vld [vmem:[%s334_s8 + $0x20] sm:$0xff] (!%p326_p0)  ;;  %s637_s17 = sshll.u32 (!%p326_p0), %s527_s15, 7  ;;  %s1121_s4 = sld [smem:[#allocation14_spill]] (!%p326_p0) }
  0x4a   : > { %395 = vst [vmem:[%s363_s10 + $0x10] sm:$0xff] (!%p326_p0), %v385_v14  ;;  %v388_v17 = vld [vmem:[%s334_s8 + $0x28] sm:$0xff] (!%p326_p0)  ;;  %396 = vst [vmem:[%s363_s10 + $0x18] sm:$0xff] (!%p326_p0), %v386_v15  ;;  %v389_v18 = vld [vmem:[%s334_s8 + $0x30] sm:$0xff] (!%p326_p0)  ;;  %s724_s16 = scalar_lea.vmem (!%p326_p0), %s994_s11, 1280  ;;  %s854_s6 = smov (!%p326_p0), [#allocation4]  }
  0x4b   : > { %397 = vst [vmem:[%s363_s10 + $0x20] sm:$0xff] %v387_v16  ;;  %398 = vst [vmem:[%s363_s10 + $0x28] sm:$0xff] %v388_v17  ;;  %v390_v19 = vld [vmem:[%s334_s8 + $0x38] sm:$0xff]  ;;  %v391_v20 = vld [vmem:[%s334_s8 + $0x40] sm:$0xff]  ;;  %p725_p1 = scmp.ne.s32.totalorder %s994_s11, %s724_s16 }
  0x4c   : > { %399 = vst [vmem:[%s363_s10 + $0x30] sm:$0xff] %v389_v18  ;;  %400 = vst [vmem:[%s363_s10 + $0x38] sm:$0xff] %v390_v19  ;;  %v392_v21 = vld [vmem:[%s334_s8 + $0x48] sm:$0xff] }
  0x4d   : > { %401 = vst [vmem:[%s363_s10 + $0x40] sm:$0xff] %v391_v20  ;;  %402 = vst [vmem:[%s363_s10 + $0x48] sm:$0xff] %v392_v21  ;;  %p726_p2 = pnand %p725_p1, %p955_p7  ;;  %s728_s10 = sshll.u32 %s854_s6, 4  ;;  %s729_s10 = int_to_ptr.vmem [resolvable:$false] %s728_s10 }
  0x4e   : > { %s730_s15 = scalar_lea.vmem %s729_s10, 2560  ;;  %p731_p4 = scmp.lt.s32.totalorder %s994_s11, %s729_s10 }
  0x4f   : > { %s529_s9 = scalar_lea.hbm %s1121_s4, %s637_s17  ;;  %p727_p3 = pneg %p726_p2 }
  0x50   : > { %s1007_s7 = scalar_lea.hbm %s529_s9, 128  ;;  %p732_p5 = scmp.lt.s32.totalorder %s730_s15, %s724_s16 }
  0x52   : > { %p733_p6 = por %p732_p5, %p731_p4 }
  0x54   : > { %p734_p8 = pnand %p733_p6, %p727_p3 }
  0x56   : > { %737 = shalt.err (!%p734_p8)
}
  0x57   : > { %s752_s25 = scalar_lea.hbm %s529_s9, 1408  ;;  %s742_s6 = scalar_lea.hbm %s1121_s4, 20480 }
  0x58   : > { %p739_p9 = scmp.ne.s32.totalorder %s1007_s7, %s752_s25  ;;  %p743_p13 = scmp.lt.u32.totalorder %s1007_s7, %s1121_s4 }
  0x59   : > { %p744_p0 = scmp.lt.u32.totalorder %s742_s6, %s752_s25  ;;  %p746_p2 = scmp.lt.u32.totalorder %s752_s25, %s1007_s7 }
  0x5a   : > { %p740_p11 = pnand %p739_p9, %p955_p7 }
  0x5b   : > { %p745_p1 = por %p744_p0, %p743_p13 }
  0x5c   : > { %p741_p12 = pneg %p740_p11 }
  0x5d   : > { %p747_p3 = por %p746_p2, %p745_p1 }
  0x5f   : > { %p748_p4 = pnand %p747_p3, %p741_p12 }
  0x61   : > { %751 = shalt.err (!%p748_p4)
}
  0x62   : > { %s855_s9 = smov 128   ;;  %s856_s16 = smov 1024  }
  0x63   : > { %s857_s10 = smov 8   ;;  %s1122_s30 = scalar_lea.sflag [#allocation5], %s986_s28 }
  0x64   : > { %645 = dma.vmem_to_hbm [thread:$0]  (%p955_p7), %s994_s11, 1280, %s1007_s7, %s1122_s30, %s855_s9, %s856_s16, %s857_s10  }
  0x65   : > { %s639_s8 = sshll.u32 %s840_s20, 4  ;;  %s1123_s15 = sshll.u32 %s1000_s24, 4  ;;  %s1039_s15 = int_to_ptr.vmem [resolvable:$true] %s1123_s15 }
  0x66   : > { %s1124_s25 = sshll.u32 %s836_s19, 1  ;;  %s413_s27 = scalar_lea.sflag [#allocation7], %s986_s28 }
  0x67   : > { %s534_s17 = sadd.s32 %s639_s8, %s1124_s25  ;;  %s753_s26 = scalar_lea.vmem %s1039_s15, 256 }
  0x68   : > { %s640_s29 = sshll.u32 %s534_s17, 7  ;;  %p754_p5 = scmp.ne.s32.totalorder %s1039_s15, %s753_s26 }
  0x69   : > { %s536_s3 = scalar_lea.hbm %s1107_s5, %s640_s29  ;;  %s858_s20 = smov [#allocation6]  }
  0x6a   : > { %s1046_s4 = scalar_lea.hbm %s536_s3, 128  ;;  %p755_p6 = pnand %p754_p5, %p955_p7 }
  0x6b   : > { %s757_s11 = sshll.u32 %s858_s20, 4  ;;  %s758_s11 = int_to_ptr.vmem [resolvable:$false] %s757_s11 }
  0x6c   : > { %p756_p8 = pneg %p755_p6  ;;  %s759_s19 = scalar_lea.vmem %s758_s11, 512 }
  0x6d   : > { %p760_p9 = scmp.lt.s32.totalorder %s1039_s15, %s758_s11  ;;  %p761_p11 = scmp.lt.s32.totalorder %s759_s19, %s753_s26 }
  0x6f   : > { %p762_p12 = por %p761_p11, %p760_p9 }
  0x71   : > { %p763_p13 = pnand %p762_p12, %p756_p8 }
  0x73   : > { %766 = shalt.err (!%p763_p13)
}
  0x74   : > { %s781_s24 = scalar_lea.hbm %s536_s3, 384  ;;  %s771_s30 = scalar_lea.hbm %s1107_s5, 4096 }
  0x75   : > { %p768_p0 = scmp.ne.s32.totalorder %s1046_s4, %s781_s24  ;;  %p772_p3 = scmp.lt.u32.totalorder %s1046_s4, %s1107_s5 }
  0x76   : > { %p773_p4 = scmp.lt.u32.totalorder %s771_s30, %s781_s24  ;;  %p775_p6 = scmp.lt.u32.totalorder %s781_s24, %s1046_s4 }
  0x77   : > { %p769_p1 = pnand %p768_p0, %p955_p7 }
  0x78   : > { %p774_p5 = por %p773_p4, %p772_p3 }
  0x79   : > { %p770_p2 = pneg %p769_p1 }
  0x7a   : > { %p776_p8 = por %p775_p6, %p774_p5 }
  0x7c   : > { %p777_p9 = pnand %p776_p8, %p770_p2 }
  0x7e   : > { %780 = shalt.err (!%p777_p9)
}
  0x7f   : > { %646 = dma.vmem_to_hbm [thread:$0]  (%p955_p7), %s1039_s15, 256, %s1046_s4, %s413_s27, %s855_s9, %s856_s16, %s857_s10  }
  0x80 PF: > { %p656_p11 = scmp.ge.s32.totalorder %s852_s23, 2  ;;  %s465_s3 = sand.u32 1, %s824_s0  }
  0x81   : > { %s466_s26 = scalar_lea.sflag [#allocation5], %s465_s3 }
  0x82   : > { %p650_p12 = pnand %p656_p11, %p962_p10 }
  0x84   : > { %815 = dma.done.wait (!%p650_p12), %s466_s26, 1280  }
  0x85   : > { %817 = vsyncadd (!%p650_p12), %s466_s26, 4294966016  ;;  %s475_s12 = scalar_lea.sflag [#allocation7], %s465_s3 }
  0x86   : > { %819 = dma.done.wait (!%p650_p12), %s475_s12, 256  }
  0x87   : > { %821 = vsyncadd (!%p650_p12), %s475_s12, 4294967040  ;;  %s22_s23 = sadd.s32 1, %s852_s23   ;;  %s1125_s4 = sld [smem:[#allocation10_spill]] }
  0x88   : > { %p19_p13 = scmp.ge.s32.totalorder %s22_s23, 10   ;;  %s1126_s27 = sld [smem:[#allocation11_spill]] }
  0x89   : > { %s1127_s0 = smov %s828_s18  ;;  %s1128_s18 = smov %s832_s1 }
  0x8a   : > { %s1129_s1 = smov %s960_s13  ;;  %s1130_s19 = smov %s844_s21 }
  0x8b   : > { %s1131_s20 = smov %s848_s22  ;;  %21 = sbr.rel (!%p19_p13) target bundleno = 11 (0xb), region = 169 }
  0x8d   : > { %s1132_s21 = smov %s1125_s4 }
  0x8e   : > { %s1133_s22 = smov %s1126_s27 }
  0x92   :  { %480 = vsyncpa [#allocation5], 1 }
  0x93   :  { %482 = vsyncpa [#allocation5 + $0x1], 1 }
  0x94   :  { %483 = vsyncpa [#allocation7], 1 }
  0x95   :  { %485 = vsyncpa [#allocation7 + $0x1], 1 }

</bundles_post_ra>
